<compile_context>
chip_gen: v7x
topology: tpu7x:2x2x1
jax: 0.10.0
libtpu: 0.0.40
codegen_flags: <defaults>
</compile_context>

<pallas_src>
import jax
import jax.numpy as jnp
from jax import lax
from jax.experimental import pallas as pl
from jax.experimental.pallas import tpu as pltpu


def _round_up(n, m):
    return ((n + m - 1) // m) * m


def _cdiv(a, b):
    return (a + b - 1) // b


def _gelu_tanh(x):
    # TODO(synk): PyTorch nn.GELU() default is the exact erf form; the tanh
    # approximation (|diff| < ~1e-3) is used because tanh has a guaranteed
    # EUP lowering in Mosaic.
    c = jnp.float32(0.7978845608028654)  # sqrt(2/pi)
    return 0.5 * x * (1.0 + jnp.tanh(c * (x + 0.044715 * x * x * x)))


def _ffn_kernel(x_ref, w1_ref, b1_ref, w2_ref, b2_ref, o_ref, acc_ref):
    # x_ref:  (bm, dim)  f32     w1_ref: (bn, dim) bf16   b1_ref: (1, bn) f32
    # w2_ref: (dim, bn)  bf16    b2_ref: (1, dim)  f32
    # o_ref:  (bm, dim)  f32     acc_ref: (bm, dim) f32 scratch accumulator
    k = pl.program_id(1)

    @pl.when(k == 0)
    def _():
        acc_ref[...] = jnp.zeros_like(acc_ref)

    x_bf = x_ref[...].astype(jnp.bfloat16)
    # (bm, dim) . (bn, dim)^T -> (bm, bn); contract dim<->dim directly against
    # the PyTorch weight layout (no wrapper transpose), f32 accumulation.
    h = lax.dot_general(
        x_bf, w1_ref[...],
        dimension_numbers=(((1,), (1,)), ((), ())),
        preferred_element_type=jnp.float32)
    h = _gelu_tanh(h + b1_ref[...])
    h_bf = h.astype(jnp.bfloat16)            # halve the live intermediate
    # (bm, bn) . (dim, bn)^T -> (bm, dim); accumulate the inner_dim chunk.
    acc_ref[...] += lax.dot_general(
        h_bf, w2_ref[...],
        dimension_numbers=(((1,), (1,)), ((), ())),
        preferred_element_type=jnp.float32)

    @pl.when(k == pl.num_programs(1) - 1)
    def _():
        o_ref[...] = (acc_ref[...] + b2_ref[...]).astype(o_ref.dtype)


def _pick_block_m(M, block_m):
    bm = min(block_m, _round_up(M, 8))
    # v7x: the "parallel" M axis only helps if there are >= 2 grid steps to
    # shard across the two TensorCores; split M when it is big enough.
    if M >= 512 and _cdiv(M, bm) < 2:
        bm = _round_up(_cdiv(M, 2), 256)
    return bm


def _pick_inner_tile(inner, block_n):
    if inner <= block_n:
        return inner
    # Largest multiple of 256 (MXU-aligned, lane-legal) <= block_n that divides
    # inner; realistic transformer inner_dims (dim * 4) always hit this.
    for cand in range(block_n, 0, -256):
        if inner % cand == 0:
            return cand
    return inner  # odd inner_dim: fall back to fully-resident weights


def feed_forward(x, w1, b1, w2, b2, *, block_m=512, block_n=512):
    """FeedForward forward pass.

    x:  (..., dim)                               float32
    w1: (inner_dim, dim), b1: (inner_dim,)       -- PyTorch Linear(dim, inner_dim)
    w2: (dim, inner_dim), b2: (dim,)             -- PyTorch Linear(inner_dim, dim)
    Returns: (..., dim) float32
    """
    *batch_dims, dim = x.shape
    inner = w1.shape[0]

    M = 1
    for d in batch_dims:
        M *= d
    x2 = x.reshape(M, dim)

    bm = _pick_block_m(M, block_m)
    bn = _pick_inner_tile(inner, block_n)

    # bf16 weights: native MXU dtype on v5e/v6e/v7x; halves weight HBM traffic
    # and VMEM footprint.  Biases stay f32 (added to the f32 accumulator).
    w1_bf = w1.astype(jnp.bfloat16)          # (inner, dim) -- PyTorch layout
    w2_bf = w2.astype(jnp.bfloat16)          # (dim, inner) -- PyTorch layout
    b1r = b1.reshape(1, inner).astype(jnp.float32)
    b2r = b2.reshape(1, dim).astype(jnp.float32)

    grid = (_cdiv(M, bm), inner // bn)       # reduction axis (inner) last

    cost = pl.CostEstimate(
        flops=4 * M * dim * inner,
        transcendentals=M * inner,
        bytes_accessed=8 * M * dim + 4 * dim * inner + 4 * (inner + dim),
    )

    y = pl.pallas_call(
        _ffn_kernel,
        out_shape=jax.ShapeDtypeStruct((M, dim), x.dtype),
        grid=grid,
        in_specs=[
            pl.BlockSpec((bm, dim), lambda i, k: (i, 0)),   # x tile (resident over k)
            pl.BlockSpec((bn, dim), lambda i, k: (k, 0)),   # W1 inner-chunk
            pl.BlockSpec((1, bn), lambda i, k: (0, k)),     # b1 inner-chunk
            pl.BlockSpec((dim, bn), lambda i, k: (0, k)),   # W2 inner-chunk
            pl.BlockSpec((1, dim), lambda i, k: (0, 0)),    # b2 (resident)
        ],
        out_specs=pl.BlockSpec((bm, dim), lambda i, k: (i, 0)),
        scratch_shapes=[pltpu.VMEM((bm, dim), jnp.float32)],
        compiler_params=pltpu.CompilerParams(
            dimension_semantics=("parallel", "arbitrary"),
        ),
        cost_estimate=cost,
    )(x2, w1_bf, b1r, w2_bf, b2r)

    return y.reshape(*batch_dims, dim)


def _reference(x, w1, b1, w2, b2):
    # Pure-JAX f32 reference mirroring the PyTorch module (same GELU variant).
    h = jnp.einsum("...d,id->...i", x, w1) + b1
    h = _gelu_tanh(h)
    return jnp.einsum("...i,di->...d", h, w2) + b2


if __name__ == "__main__":
    key = jax.random.PRNGKey(0)
    kx, kw1, kb1, kw2, kb2 = jax.random.split(key, 5)

    B, L, dim, mult = 2, 8, 32, 4
    inner = dim * mult

    bound1 = 1.0 / (dim ** 0.5)
    bound2 = 1.0 / (inner ** 0.5)
    w1 = jax.random.uniform(kw1, (inner, dim), jnp.float32, -bound1, bound1)
    b1 = jax.random.uniform(kb1, (inner,), jnp.float32, -bound1, bound1)
    w2 = jax.random.uniform(kw2, (dim, inner), jnp.float32, -bound2, bound2)
    b2 = jax.random.uniform(kb2, (dim,), jnp.float32, -bound2, bound2)
    x = jax.random.normal(kx, (B, L, dim), jnp.float32)

    ffn = jax.jit(feed_forward)
    out = jax.block_until_ready(ffn(x, w1, b1, w2, b2))

    assert out.shape == (B, L, dim), out.shape

    ref = _reference(x, w1, b1, w2, b2)
    err = float(jnp.max(jnp.abs(out - ref)))
    # bf16 MXU inputs with f32 accumulation vs f32 reference.
    assert err < 5e-2, f"mismatch vs reference: max abs err = {err}"

    print("KERNEL_OK")
</pallas_src>

<mosaic_0001>
module attributes {stable_mosaic.version = 11 : i64} {
  func.func @_ffn_kernel(%arg0: i32, %arg1: i32, %arg2: memref<16x32xf32, #tpu.memory_space<vmem>>, %arg3: memref<128x32xbf16, #tpu.memory_space<vmem>>, %arg4: memref<1x128xf32, #tpu.memory_space<vmem>>, %arg5: memref<32x128xbf16, #tpu.memory_space<vmem>>, %arg6: memref<1x32xf32, #tpu.memory_space<vmem>>, %arg7: memref<16x32xf32, #tpu.memory_space<vmem>>, %arg8: memref<16x32xf32, #tpu.memory_space<vmem>>) attributes {dimension_semantics = [#tpu.dimension_semantics<parallel>, #tpu.dimension_semantics<arbitrary>], iteration_bounds = array<i64: 1, 1>, scalar_prefetch = 0 : i64, scratch_operands = 1 : i64, tpu.core_type = #tpu.core_type<tc>, window_params = [{transform_indices = @transform_0, window_bounds = array<i64: 16, 32>}, {transform_indices = @transform_1, window_bounds = array<i64: 128, 32>}, {transform_indices = @transform_2, window_bounds = array<i64: 1, 128>}, {transform_indices = @transform_3, window_bounds = array<i64: 32, 128>}, {pipeline_mode = #tpu.pipeline_mode<synchronous>, transform_indices = @transform_4, window_bounds = array<i64: 1, 32>}, {transform_indices = @transform_5, window_bounds = array<i64: 16, 32>}]} {
    %c0_i32 = arith.constant 0 : i32
    %0 = arith.cmpi eq, %arg1, %c0_i32 : i32
    %1 = arith.extui %0 : i1 to i32
    %c0_i32_0 = arith.constant 0 : i32
    %2 = arith.cmpi ne, %1, %c0_i32_0 : i32
    scf.if %2 {
      %cst_19 = arith.constant 0.000000e+00 : f32
      %32 = vector.broadcast %cst_19 : f32 to vector<16x32xf32>
      %c0_20 = arith.constant 0 : index
      %c0_21 = arith.constant 0 : index
      %33 = vector.load %arg8[%c0_20, %c0_21] : memref<16x32xf32, #tpu.memory_space<vmem>>, vector<16x32xf32>
      tpu.vector_store %arg8[%c0_20, %c0_21], %32 {strides = array<i32>} : memref<16x32xf32, #tpu.memory_space<vmem>>, vector<16x32xf32>,
    } else {
    }
    %c0 = arith.constant 0 : index
    %c0_1 = arith.constant 0 : index
    %3 = vector.load %arg2[%c0, %c0_1] : memref<16x32xf32, #tpu.memory_space<vmem>>, vector<16x32xf32>
    %4 = arith.truncf %3 : vector<16x32xf32> to vector<16x32xbf16>
    %c0_2 = arith.constant 0 : index
    %c0_3 = arith.constant 0 : index
    %5 = vector.load %arg3[%c0_2, %c0_3] : memref<128x32xbf16, #tpu.memory_space<vmem>>, vector<128x32xbf16>
    %cst = arith.constant dense<0.000000e+00> : vector<16x128xf32>
    %6 = tpu.matmul %4, %5, %cst {dimension_numbers = #tpu.dot_dimension_numbers<[1], [1], [0], [0], [0, 0, 1, 0], [], []>} : vector<16x32xbf16>, vector<128x32xbf16>, vector<16x128xf32> -> vector<16x128xf32>
    %c0_4 = arith.constant 0 : index
    %c0_5 = arith.constant 0 : index
    %7 = vector.load %arg4[%c0_4, %c0_5] : memref<1x128xf32, #tpu.memory_space<vmem>>, vector<1x128xf32>
    %8 = vector.broadcast %7 : vector<1x128xf32> to vector<16x128xf32>
    %9 = arith.addf %6, %8 : vector<16x128xf32>
    %cst_6 = arith.constant 5.000000e-01 : f32
    %10 = vector.broadcast %cst_6 : f32 to vector<16x128xf32>
    %11 = arith.mulf %10, %9 : vector<16x128xf32>
    %cst_7 = arith.constant 4.471500e-02 : f32
    %12 = vector.broadcast %cst_7 : f32 to vector<16x128xf32>
    %13 = arith.mulf %12, %9 : vector<16x128xf32>
    %14 = arith.mulf %13, %9 : vector<16x128xf32>
    %15 = arith.mulf %14, %9 : vector<16x128xf32>
    %16 = arith.addf %9, %15 : vector<16x128xf32>
    %cst_8 = arith.constant 0.797884583 : f32
    %17 = vector.broadcast %cst_8 : f32 to vector<16x128xf32>
    %18 = arith.mulf %17, %16 : vector<16x128xf32>
    %19 = math.tanh %18 : vector<16x128xf32>
    %cst_9 = arith.constant 1.000000e+00 : f32
    %20 = vector.broadcast %cst_9 : f32 to vector<16x128xf32>
    %21 = arith.addf %20, %19 : vector<16x128xf32>
    %22 = arith.mulf %11, %21 : vector<16x128xf32>
    %23 = arith.truncf %22 : vector<16x128xf32> to vector<16x128xbf16>
    %c0_10 = arith.constant 0 : index
    %c0_11 = arith.constant 0 : index
    %24 = vector.load %arg8[%c0_10, %c0_11] : memref<16x32xf32, #tpu.memory_space<vmem>>, vector<16x32xf32>
    %c0_12 = arith.constant 0 : index
    %c0_13 = arith.constant 0 : index
    %25 = vector.load %arg5[%c0_12, %c0_13] : memref<32x128xbf16, #tpu.memory_space<vmem>>, vector<32x128xbf16>
    %cst_14 = arith.constant dense<0.000000e+00> : vector<16x32xf32>
    %26 = tpu.matmul %23, %25, %cst_14 {dimension_numbers = #tpu.dot_dimension_numbers<[1], [1], [0], [0], [0, 0, 1, 0], [], []>} : vector<16x128xbf16>, vector<32x128xbf16>, vector<16x32xf32> -> vector<16x32xf32>
    %27 = arith.addf %24, %26 : vector<16x32xf32>
    %c0_15 = arith.constant 0 : index
    %c0_16 = arith.constant 0 : index
    %28 = vector.load %arg8[%c0_15, %c0_16] : memref<16x32xf32, #tpu.memory_space<vmem>>, vector<16x32xf32>
    tpu.vector_store %arg8[%c0_15, %c0_16], %27 {strides = array<i32>} : memref<16x32xf32, #tpu.memory_space<vmem>>, vector<16x32xf32>,
    %c0_i32_17 = arith.constant 0 : i32
    %29 = arith.cmpi eq, %arg1, %c0_i32_17 : i32
    %30 = arith.extui %29 : i1 to i32
    %c0_i32_18 = arith.constant 0 : i32
    %31 = arith.cmpi ne, %30, %c0_i32_18 : i32
    scf.if %31 {
      %c0_19 = arith.constant 0 : index
      %c0_20 = arith.constant 0 : index
      %32 = vector.load %arg8[%c0_19, %c0_20] : memref<16x32xf32, #tpu.memory_space<vmem>>, vector<16x32xf32>
      %c0_21 = arith.constant 0 : index
      %c0_22 = arith.constant 0 : index
      %33 = vector.load %arg6[%c0_21, %c0_22] : memref<1x32xf32, #tpu.memory_space<vmem>>, vector<1x32xf32>
      %34 = vector.broadcast %33 : vector<1x32xf32> to vector<16x32xf32>
      %35 = arith.addf %32, %34 : vector<16x32xf32>
      %c0_23 = arith.constant 0 : index
      %c0_24 = arith.constant 0 : index
      %36 = vector.load %arg7[%c0_23, %c0_24] : memref<16x32xf32, #tpu.memory_space<vmem>>, vector<16x32xf32>
      tpu.vector_store %arg7[%c0_23, %c0_24], %35 {strides = array<i32>} : memref<16x32xf32, #tpu.memory_space<vmem>>, vector<16x32xf32>,
    } else {
    }
    return
  }
  func.func @transform_0(%arg0: i32, %arg1: i32) -> (i32, i32) {
    %c0_i32 = arith.constant 0 : i32
    %c0_i32_0 = arith.constant 0 : i32
    return %arg0, %c0_i32 : i32, i32
  }
  func.func @transform_1(%arg0: i32, %arg1: i32) -> (i32, i32) {
    %c0_i32 = arith.constant 0 : i32
    %c0_i32_0 = arith.constant 0 : i32
    return %arg1, %c0_i32 : i32, i32
  }
  func.func @transform_2(%arg0: i32, %arg1: i32) -> (i32, i32) {
    %c0_i32 = arith.constant 0 : i32
    %c0_i32_0 = arith.constant 0 : i32
    return %c0_i32, %arg1 : i32, i32
  }
  func.func @transform_3(%arg0: i32, %arg1: i32) -> (i32, i32) {
    %c0_i32 = arith.constant 0 : i32
    %c0_i32_0 = arith.constant 0 : i32
    return %c0_i32, %arg1 : i32, i32
  }
  func.func @transform_4(%arg0: i32, %arg1: i32) -> (i32, i32) {
    %c0_i32 = arith.constant 0 : i32
    %c0_i32_0 = arith.constant 0 : i32
    %c0_i32_1 = arith.constant 0 : i32
    return %c0_i32, %c0_i32_0 : i32, i32
  }
  func.func @transform_5(%arg0: i32, %arg1: i32) -> (i32, i32) {
    %c0_i32 = arith.constant 0 : i32
    %c0_i32_0 = arith.constant 0 : i32
    return %arg0, %c0_i32 : i32, i32
  }
}

</mosaic_0001>

<bundles_post_ra>
// kernel: feed_forward.1
= control target key start
LH: loop header
LB: loop body
LE: loop exit
PB: predicated region body
PF: predicated region fallthrough
CT: control target
= control target key end

     0   :  { %vm26_vm0 = vcmask 261120   ;;  %v374_v0 = vmov 0.0   ;;  %vm375_vm1 = vmmov 0   ;;  %s478_s0 = inlined_call_operand.vmem [shape: f32[16,32], index: 0, kind: input, shape index: {}]   ;;  %s479_s1 = inlined_call_operand.vmem [shape: bf16[128,32], index: 1, kind: input, shape index: {}]   ;;  %s480_s2 = inlined_call_operand.vmem [shape: f32[1,128], index: 2, kind: input, shape index: {}]   ;;  %s481_s3 = inlined_call_operand.vmem [shape: bf16[32,128], index: 3, kind: input, shape index: {}]   ;;  %s482_s4 = inlined_call_operand.vmem [shape: f32[1,32], index: 4, kind: input, shape index: {}]   ;;  %s483_s5 = inlined_call_operand.hbm [shape: f32[16,32], index: 5, kind: output, shape index: {}]  }
   0x1   :  { %303 = vmatprep.subr.bf16.mxu0 %v374_v0  ;;  %v336_v1 = vld [vmem:[%s479_s1] sm:$0xff]   ;;  %27 = vst.msk [vmem:[#allocation2] sm:$0xff] %vm26_vm0, %v374_v0  ;;  %28 = vst.msk [vmem:[#allocation2 + $0x8] sm:$0xff] %vm26_vm0, %v374_v0  ;;  %323 = vmatprep.subr.bf16.mxu1 %v374_v0  ;;  %v337_v3 = vld [vmem:[%s479_s1 + $0x8] sm:$0xff]  }
   0x2   :  { %319 = vmatprep.mubr.msk.bf16.mxu0 %vm375_vm1, %v374_v0  ;;  %327 = vmatprep.mubr.msk.bf16.mxu1 %vm375_vm1, %v374_v0  ;;  %v100_v2 = vsel %vm26_vm0, %v336_v1, 0  ;;  %v103_v4 = vsel %vm26_vm0, %v337_v3, 0 }
   0x3   :  { %304 = vmatpush3.bf16.xpose.msra.mxu0 %v100_v2 }
   0x4   :  { %305 = vmatprep.subr.bf16.mxu0 %v374_v0 }
   0x5   :  { %10 = vsyncpa [#allocation4], 0  ;;  %v338_v5 = vld [vmem:[%s479_s1 + $0x10] sm:$0xff]   ;;  %v339_v7 = vld [vmem:[%s479_s1 + $0x18] sm:$0xff]  }
   0x6   :  { %v106_v6 = vsel %vm26_vm0, %v338_v5, 0  ;;  %v109_v8 = vsel %vm26_vm0, %v339_v7, 0  ;;  %v340_v9 = vld [vmem:[%s479_s1 + $0x20] sm:$0xff]   ;;  %v341_v11 = vld [vmem:[%s479_s1 + $0x28] sm:$0xff]   ;;  %v342_v13 = vld [vmem:[%s479_s1 + $0x30] sm:$0xff]  }
   0x7   :  { %v112_v10 = vsel %vm26_vm0, %v340_v9, 0  ;;  %v115_v12 = vsel %vm26_vm0, %v341_v11, 0  ;;  %v118_v14 = vsel %vm26_vm0, %v342_v13, 0  ;;  %v343_v15 = vld [vmem:[%s479_s1 + $0x38] sm:$0xff]   ;;  %v29_v17 = vld [vmem:[%s478_s0] sm:$0xff]  ;;  %v30_v18 = vld [vmem:[%s478_s0 + $0x8] sm:$0xff] }
   0x8   :  { %v121_v16 = vsel %vm26_vm0, %v343_v15, 0  ;;  %v31_v19 = vpack.c.bf16 %v30_v18, %v29_v17  ;;  %v344_v20 = vld [vmem:[%s481_s3] sm:$0xff]   ;;  %v345_v21 = vld [vmem:[%s481_s3 + $0x8] sm:$0xff]   ;;  %s376_s3 = smov [#allocation3]  }
   0x9   :  { %324 = vmatpush3.bf16.xpose.msra.mxu1 %v344_v20  ;;  %v278_v22 = vld [vmem:[%s480_s2] ss:$0 sm:$0xff]  ;;  %v184_v50 = vld [vmem:[#allocation2 + $0x8] sm:$0xff]  ;;  %s267_s18 = sshll.u32 %s376_s3, 4  ;;  %s268_s18 = int_to_ptr.vmem [resolvable:$true] %s267_s18 }
   0xa   :  { %325 = vmatprep.subr.bf16.mxu1 %v374_v0  ;;  %v183_v48 = vld [vmem:[#allocation2] sm:$0xff]  ;;  %s350_s19 = scalar_lea.vmem %s268_s18, 256  ;;  %p355_p1 = scmp.lt.s32.totalorder %s268_s18, %s268_s18 }
   0xb   :  { %306 = vmatpush3.bf16.xpose.msra.mxu0 %v103_v4  ;;  %v290_v56 = vld [vmem:[%s482_s4] ss:$0 sm:$0xff]  ;;  %p351_p0 = scmp.ne.s32.totalorder %s268_s18, %s350_s19  ;;  %p356_p2 = scmp.lt.s32.totalorder %s350_s19, %s350_s19 }
   0xc   :  { %307 = vmatprep.subr.bf16.mxu0 %v374_v0 }
   0xd   :  { %p357_p3 = por %p356_p2, %p355_p1 }
   0xf   :  { %p358_p4 = pnand %p357_p3, %p351_p0 }
  0x11   :  { %326 = vmatpush3.bf16.xpose.msra.mxu1 %v345_v21 }
  0x13   :  { %308 = vmatpush3.bf16.xpose.msra.mxu0 %v106_v6 }
  0x14   :  { %309 = vmatprep.subr.bf16.mxu0 %v374_v0 }
  0x1b   :  { %310 = vmatpush3.bf16.xpose.msra.mxu0 %v109_v8 }
  0x1c   :  { %311 = vmatprep.subr.bf16.mxu0 %v374_v0 }
  0x23   :  { %312 = vmatpush3.bf16.xpose.msra.mxu0 %v112_v10 }
  0x24   :  { %313 = vmatprep.subr.bf16.mxu0 %v374_v0 }
  0x2b   :  { %314 = vmatpush3.bf16.xpose.msra.mxu0 %v115_v12 }
  0x2c   :  { %315 = vmatprep.subr.bf16.mxu0 %v374_v0 }
  0x33   :  { %316 = vmatpush3.bf16.xpose.msra.mxu0 %v118_v14 }
  0x34   :  { %317 = vmatprep.subr.bf16.mxu0 %v374_v0 }
  0x3b   :  { %318 = vmatpush3.bf16.xpose.msra.mxu0 %v121_v16 }
  0x42   :  { %320 = vmatmul.mubr.msk.bf16.vlgmr.msra.gmra.mrb[0].mxu0 %vm26_vm0, %v31_v19 }
 0x115   :  { %v157_v23 = vpop.f32.mrb[0].mxu0 }
 0x116   :  { %v158_v24 = vadd.f32 %v278_v22, %v157_v23  ;;  %v321_v25 = vpop.f32.mrb[1].mxu0 }
 0x117   :  { %v160_v26 = vpop.f32.mrb[2].mxu0 }
 0x118   :  { %v166_v27 = vmul.f32 0.044715, %v158_v24  ;;  %v161_v28 = vadd.f32 %v278_v22, %v160_v26  ;;  %v322_v29 = vpop.f32.mrb[3].mxu0  ;;  %v164_v42 = vmul.f32 0.5, %v158_v24 }
 0x11a   :  { %v168_v30 = vmul.f32 %v166_v27, %v158_v24  ;;  %v167_v31 = vmul.f32 0.044715, %v161_v28  ;;  %v165_v43 = vmul.f32 0.5, %v161_v28 }
 0x11c   :  { %v170_v32 = vmul.f32 %v168_v30, %v158_v24  ;;  %v169_v33 = vmul.f32 %v167_v31, %v161_v28 }
 0x11e   :  { %v171_v34 = vmul.f32 %v169_v33, %v161_v28  ;;  %v172_v35 = vadd.f32 %v170_v32, %v158_v24 }
 0x120   :  { %v173_v36 = vadd.f32 %v171_v34, %v161_v28  ;;  %v174_v37 = vmul.f32 0.7978846, %v172_v35 }
 0x122   :  { %v175_v38 = vmul.f32 0.7978846, %v173_v36  ;;  %346 = vtanh.f32 %v174_v37 }
 0x124   :  { %348 = vtanh.f32 %v175_v38 }
 0x12c   :  { %v347_v39 = vpop.eup %346 }
 0x12d   :  { %v178_v40 = vadd.f32 1.0, %v347_v39 }
 0x12e   :  { %v349_v41 = vpop.eup %348 }
 0x12f   :  { %v179_v44 = vadd.f32 1.0, %v349_v41  ;;  %v180_v45 = vmul.f32 %v178_v40, %v164_v42 }
 0x131   :  { %v181_v46 = vmul.f32 %v179_v44, %v165_v43 }
 0x133   :  { %v182_v47 = vpack.c.bf16 %v181_v46, %v180_v45 }
 0x135   :  { %328 = vmatmul.mubr.bf16.vlgmr.msra.gmra.mrb[0].mxu1 %v182_v47 }
 0x208   :  { %v235_v49 = vpop.f32.mrb[0].mxu1 }
 0x209   :  { %v242_v51 = vadd.f32 %v235_v49, %v183_v48  ;;  %v329_v52 = vpop.f32.mrb[1].mxu1 }
 0x20a   :  { %v238_v53 = vpop.f32.mrb[2].mxu1 }
 0x20b   :  { %244 = vst.msk [vmem:[#allocation2] sm:$0xff] %vm26_vm0, %v242_v51  ;;  %v243_v54 = vadd.f32 %v238_v53, %v184_v50  ;;  %v330_v55 = vpop.f32.mrb[3].mxu1 }
 0x20d   :  { %245 = vst.msk [vmem:[#allocation2 + $0x8] sm:$0xff] %vm26_vm0, %v243_v54 }
 0x212   :  { %v249_v57 = vld [vmem:[#allocation2] sm:$0xff] }
 0x213   :  { %v258_v58 = vadd.f32 %v290_v56, %v249_v57 }
 0x214   :  { %v250_v59 = vld [vmem:[#allocation2 + $0x8] sm:$0xff] }
 0x215   :  { %v259_v60 = vadd.f32 %v290_v56, %v250_v59  ;;  %260 = vst.msk [vmem:[#allocation3] sm:$0xff] %vm26_vm0, %v258_v58 }
 0x217   :  { %261 = vst.msk [vmem:[#allocation3 + $0x8] sm:$0xff] %vm26_vm0, %v259_v60 }
 0x218   :  { %361 = shalt.err (!%p358_p4)
}
 0x219   :  { %s362_s21 = scalar_lea.hbm %s483_s5, 256 }
 0x21a   :  { %p363_p5 = scmp.ne.s32.totalorder %s483_s5, %s362_s21  ;;  %p366_p6 = scmp.lt.u32.totalorder %s362_s21, %s483_s5 }
 0x21c   :  { %p368_p7 = pnand %p366_p6, %p363_p5 }
 0x21e   :  { %371 = shalt.err (!%p368_p7)
}
 0x21f   :  { %s377_s26 = smov 128   ;;  %s378_s27 = smov 8  }
 0x220   :  { %273 = dma.vmem_to_hbm [thread:$0]  %s268_s18, 256, %s483_s5, [#allocation4], %s377_s26, %s377_s26, %s378_s27  }
 0x221   :  { %372 = dma.done.wait [#allocation4], 256  }
 0x222   :  { %373 = vsyncadd [#allocation4], 4294967040 }
 0x223   :  { %277 = vsyncpa [#allocation4], 1 }

</bundles_post_ra>
